<compile_context>
chip_gen: v5e
topology: v5e:2x2
jax: 0.10.0
libtpu: 0.0.40
codegen_flags: <defaults>
</compile_context>

<pallas_src>
import functools

import numpy as np
import jax
import jax.numpy as jnp
from jax import lax
from jax.experimental import pallas as pl
from jax.experimental.pallas import tpu as pltpu

LANES = 128
NQ = 4  # per-mask accumulated quantities: S_a, S_b, num_1, count  (num_0 = count - num_1)


def _round_up(a, b):
    return -(-a // b) * b


def _int_pow(x, g):
    """x ** g for a small non-negative integer g via repeated multiplication (EUP relief)."""
    r = None
    base = x
    e = int(g)
    while e > 0:
        if e & 1:
            r = base if r is None else r * base
        e >>= 1
        if e:
            base = base * base
    return jnp.ones_like(x) if r is None else r


@functools.lru_cache(maxsize=1)
def _num_tensorcores():
    """Best-effort TensorCore count (2 on v7x / megacore parts, 1 on v5e/v6e)."""
    try:
        info = pltpu.get_tpu_info()
        for name in ("num_cores", "core_count", "tensorcore_count",
                     "num_tensorcores", "cores_per_chip"):
            v = getattr(info, name, None)
            if isinstance(v, (int, np.integer)) and 1 <= int(v) <= 8:
                return int(v)
    except Exception:
        pass
    try:
        v = getattr(jax.devices()[0], "num_cores", None)
        if isinstance(v, (int, np.integer)) and 1 <= int(v) <= 8:
            return int(v)
    except Exception:
        pass
    return 1


def _make_oc_loss_kernel(loss_type, gamma, M, tr, rc, Tc, T_real, R_valid,
                         needs_row_mask, guard_dup_steps):
    n_chunks = tr // rc

    def kernel(gt_ref, pd_ref, mask_ref, out_ref):
        c = pl.program_id(0)
        t = pl.program_id(1)
        step = c * Tc + t

        @pl.when(t == 0)
        def _():
            out_ref[...] = jnp.zeros_like(out_ref)

        def compute():
            def chunk_body(j, accs):
                base = pl.multiple_of(j * rc, rc)
                # Small rc-row chunk -> entire elementwise chain stays in vregs.
                x = pd_ref[pl.ds(base, rc), :].astype(jnp.float32)   # logits
                y = gt_ref[pl.ds(base, rc), :].astype(jnp.float32)   # targets (exact 0/1)
                if needs_row_mask:
                    rows = (step * tr + base
                            + lax.broadcasted_iota(jnp.int32, (rc, LANES), 0))
                    valid = rows < R_valid
                    x = jnp.where(valid, x, 0.0)      # sanitize OOB garbage
                    y = jnp.where(valid, y, 0.0)
                    valid_f = valid.astype(jnp.float32)

                one_m_y = 1.0 - y
                # softplus(-x) = -log sigmoid(x); softplus(x) = softplus(-x) + x
                sp_neg = jnp.maximum(-x, 0.0) + jnp.log1p(jnp.exp(-jnp.abs(x)))
                sp_pos = sp_neg + x

                if loss_type == 'bce':
                    # BCEWithLogits(pos_weight=pw) = pw*y*sp(-x) + (1-y)*sp(x)
                    a_elem = y * sp_neg               # weighted by pw = num_0/num_1 later
                    b_elem = one_m_y * sp_pos
                else:  # 'focal'
                    bce = y * sp_neg + one_m_y * sp_pos
                    prob = jnp.exp(-bce)
                    q1 = 1.0 - prob
                    if float(gamma) == int(gamma) and 0 <= int(gamma) <= 8:
                        qg = _int_pow(q1, int(gamma))
                    else:
                        qg = q1 ** jnp.float32(gamma)
                    f = qg * bce
                    a_elem = y * f                    # gt==1 contribution (weighted by r)
                    b_elem = one_m_y * f              # gt==0 contribution

                def part(v):
                    # (rc,128) -> (8,128) vector partial sum (vreg adds only, no XLU)
                    return v.reshape(rc // 8, 8, LANES).sum(axis=0)

                new_accs = list(accs)
                for m in range(M):                    # static unroll over masks
                    msk = mask_ref[m, pl.ds(base, rc), :].astype(jnp.float32)
                    if needs_row_mask:
                        msk = msk * valid_f
                    o = m * NQ
                    new_accs[o + 0] = accs[o + 0] + part(msk * a_elem)
                    new_accs[o + 1] = accs[o + 1] + part(msk * b_elem)
                    new_accs[o + 2] = accs[o + 2] + part(msk * y)    # num_1
                    new_accs[o + 3] = accs[o + 3] + part(msk)        # count
                return tuple(new_accs)

            init = tuple(jnp.zeros((8, LANES), jnp.float32) for _ in range(M * NQ))
            accs = lax.fori_loop(0, n_chunks, chunk_body, init, unroll=True)

            # Single touch of the revisited output block per grid step.
            for m in range(M):
                for q in range(NQ):
                    r0 = (m * NQ + q) * 8
                    out_ref[0, r0:r0 + 8, :] += accs[m * NQ + q]

        if guard_dup_steps:
            pl.when(step < T_real)(compute)   # skip pure-padding duplicate steps
        else:
            compute()

    return kernel


def oc_loss(gt, pd, weights, masks, loss_type='bce', gamma=2,
            row_tile=2048, num_chunks=None):
    """Pallas-TPU OCLoss.

    gt, pd : same shape (e.g. NCHW); gt assumed exactly binary {0,1}.
    masks  : (M,)+gt.shape, {0,1} (u)int8 preferred (bool gets one cast pass).
    weights: (M,).
    """
    assert loss_type in ('bce', 'focal')
    M = int(masks.shape[0])
    n = int(np.prod(gt.shape))

    # ---- inputs passed in their incoming dtypes; cast happens in-kernel ----
    gt_f = jnp.reshape(gt, (-1,))
    pd_f = jnp.reshape(pd, (-1,))
    mk = jnp.reshape(masks, (M, -1))
    if gt_f.dtype == jnp.bool_:
        gt_f = gt_f.astype(jnp.int8)
    if mk.dtype == jnp.bool_:
        # TODO(synk): have the producer emit uint8 masks so this cast pass disappears.
        mk = mk.astype(jnp.int8)

    # ---- lane-dense (R,128) layout; pad ONLY if n % 128 != 0 or array is tiny ----
    R = -(-n // LANES)
    if n % LANES != 0 or R < 32:
        R = max(_round_up(R, 8), 8)
        pad = R * LANES - n
        if pad:
            gt_f = jnp.pad(gt_f, (0, pad))
            pd_f = jnp.pad(pd_f, (0, pad))
            mk = jnp.pad(mk, ((0, 0), (0, pad)))
    gt2 = gt_f.reshape(R, LANES)
    pd2 = pd_f.reshape(R, LANES)
    mk2 = mk.reshape(M, R, LANES)
    w = jnp.asarray(weights, jnp.float32).reshape(M)

    # ---- row tiling: big DMA tile tr, small vreg-resident compute chunk rc ----
    if R < 32:
        tr = R                     # block == full dim (always legal)
        rc = tr
    else:
        tr = max(32, (min(int(row_tile), R) // 32) * 32)   # mult of 32 (int8 packing)
        rc = 64 if (M <= 2 and tr % 64 == 0) else 32
    T_real = -(-R // tr)
    needs_row_mask = (T_real * tr > R)   # last row tile is partial

    # ---- "parallel" chunk axis: one chunk per TensorCore (2 only on v7x) ----
    C = int(num_chunks) if num_chunks is not None else _num_tensorcores()
    C = max(1, min(C, T_real))
    Tc = -(-T_real // C)
    guard_dup = (C * Tc > T_real)

    kernel = _make_oc_loss_kernel(loss_type, gamma, M, tr, rc, Tc, T_real, R,
                                  needs_row_mask, guard_dup)

    def row_idx(c, t):
        # clamp so duplicate steps (uneven C split) never read out of bounds
        return jnp.minimum(c * Tc + t, T_real - 1)

    grid_spec = pltpu.PrefetchScalarGridSpec(
        num_scalar_prefetch=0,
        grid=(C, Tc),
        in_specs=[
            pl.BlockSpec((tr, LANES), lambda c, t: (row_idx(c, t), 0)),         # gt
            pl.BlockSpec((tr, LANES), lambda c, t: (row_idx(c, t), 0)),         # pd
            pl.BlockSpec((M, tr, LANES), lambda c, t: (0, row_idx(c, t), 0)),   # masks
        ],
        # per-chunk vector partial sums; revisited across t (accumulator)
        out_specs=pl.BlockSpec((1, M * NQ * 8, LANES), lambda c, t: (c, 0, 0)),
    )

    partials = pl.pallas_call(
        kernel,
        grid_spec=grid_spec,
        out_shape=jax.ShapeDtypeStruct((C, M * NQ * 8, LANES), jnp.float32),
        compiler_params=pltpu.CompilerParams(
            dimension_semantics=("parallel", "arbitrary")),
    )(gt2, pd2, mk2)

    # ---- tiny finalize in plain JAX: cross-lane reduce + per-mask loss ----
    sums = partials.reshape(C, M, NQ, 8, LANES).sum(axis=(0, 3, 4))  # (M, NQ)
    sa, sb, n1, cnt = sums[:, 0], sums[:, 1], sums[:, 2], sums[:, 3]
    n0 = cnt - n1                      # gt binary; matches (gt==0).sum()
    # NOTE: like the PyTorch reference, num_1 == 0 or empty masks give inf/NaN.
    ratio = n0 / n1
    loss_m = (ratio * sa + sb) / cnt
    return jnp.sum(w * loss_m)


def _ref_oc_loss_np(gt, pd, weights, masks, loss_type, gamma):
    """NumPy reference reproducing the PyTorch OCLoss semantics."""
    def sp(x):
        return np.maximum(x, 0.0) + np.log1p(np.exp(-np.abs(x)))

    total = 0.0
    for w, mask in zip(np.asarray(weights), masks):
        m = np.asarray(mask, bool)
        g = np.asarray(gt, np.float64)[m]
        p = np.asarray(pd, np.float64)[m]
        n0 = float((g == 0).sum())
        n1 = float((g == 1).sum())
        r = n0 / n1
        if loss_type == 'bce':
            l = r * g * sp(-p) + (1.0 - g) * sp(p)
            total += float(l.mean()) * float(w)
        else:
            bce = g * sp(-p) + (1.0 - g) * sp(p)
            prob = np.exp(-bce)
            alpha = (g == 0).astype(np.float64) + (g == 1).astype(np.float64) * r
            fl = alpha * (1.0 - prob) ** gamma * bce
            total += float(fl.mean()) * float(w)
    return total


if __name__ == "__main__":
    key = jax.random.PRNGKey(0)
    ks = jax.random.split(key, 9)

    def check(gt, pd, weights, masks, lt, gamma, **kw):
        out = jax.block_until_ready(
            oc_loss(gt, pd, weights, masks, loss_type=lt, gamma=gamma, **kw))
        ref = _ref_oc_loss_np(np.asarray(gt), np.asarray(pd),
                              np.asarray(weights), np.asarray(masks), lt, gamma)
        assert np.isfinite(ref), "degenerate reference"
        assert abs(float(out) - ref) < 2e-3 * max(1.0, abs(ref)), (lt, float(out), ref)

    # Case 1: small NCHW, bool masks (cast fallback), single full-dim row tile.
    shape = (2, 4, 16, 16)
    gt = (jax.random.uniform(ks[0], shape) > 0.5).astype(jnp.float32)
    pd = jax.random.normal(ks[1], shape, dtype=jnp.float32)
    masks = jax.random.uniform(ks[2], (2,) + shape) > 0.4
    weights = jnp.array([1.0, 0.5], dtype=jnp.float32)
    for lt in ('bce', 'focal'):
        check(gt, pd, weights, masks, lt, 2)

    # Case 2: int8 masks (no wrapper passes at all), several row tiles, partial
    # last tile exercises the in-kernel row mask + inner chunk loop; the chunk
    # axis is active (and the duplicate-step guard exercised) on 2-TC chips.
    shape2 = (4, 8, 32, 32)
    gt2 = (jax.random.uniform(ks[3], shape2) > 0.5).astype(jnp.float32)
    pd2 = jax.random.normal(ks[4], shape2, dtype=jnp.float32)
    masks2 = (jax.random.uniform(ks[5], (3,) + shape2) > 0.3).astype(jnp.int8)
    weights2 = jnp.array([1.0, 0.5, 2.0], dtype=jnp.float32)
    for lt in ('bce', 'focal'):
        check(gt2, pd2, weights2, masks2, lt, 2, row_tile=96)

    # Case 3: n not divisible by 128 -> exercises the (rare) pad fallback; gamma=3.
    shape3 = (2, 3, 7, 9)
    gt3 = (jax.random.uniform(ks[6], shape3) > 0.5).astype(jnp.float32)
    pd3 = jax.random.normal(ks[7], shape3, dtype=jnp.float32)
    masks3 = (jax.random.uniform(ks[8], (2,) + shape3) > 0.5).astype(jnp.int8)
    weights3 = jnp.array([0.75, 1.25], dtype=jnp.float32)
    for lt in ('bce', 'focal'):
        check(gt3, pd3, weights3, masks3, lt, 3)

    print("KERNEL_OK")
</pallas_src>

<mosaic_0001>
module attributes {stable_mosaic.version = 11 : i64} {
  func.func @kernel(%arg0: i32, %arg1: i32, %arg2: memref<16x128xf32, #tpu.memory_space<vmem>>, %arg3: memref<16x128xf32, #tpu.memory_space<vmem>>, %arg4: memref<2x16x128xi8, #tpu.memory_space<vmem>>, %arg5: memref<1x64x128xf32, #tpu.memory_space<vmem>>) attributes {dimension_semantics = [#tpu.dimension_semantics<parallel>, #tpu.dimension_semantics<arbitrary>], iteration_bounds = array<i64: 1, 1>, scalar_prefetch = 0 : i64, scratch_operands = 0 : i64, tpu.core_type = #tpu.core_type<tc>, window_params = [{transform_indices = @transform_0, window_bounds = array<i64: 16, 128>}, {transform_indices = @transform_1, window_bounds = array<i64: 16, 128>}, {transform_indices = @transform_2, window_bounds = array<i64: 2, 16, 128>}, {transform_indices = @transform_3, window_bounds = array<i64: 1, 64, 128>}]} {
    %c0_i32 = arith.constant 0 : i32
    %0 = arith.cmpi eq, %arg1, %c0_i32 : i32
    %1 = arith.extui %0 : i1 to i32
    %c0_i32_0 = arith.constant 0 : i32
    %2 = arith.cmpi ne, %1, %c0_i32_0 : i32
    scf.if %2 {
      %cst_66 = arith.constant 0.000000e+00 : f32
      %118 = vector.broadcast %cst_66 : f32 to vector<1x64x128xf32>
      %c0_67 = arith.constant 0 : index
      %c0_68 = arith.constant 0 : index
      %c0_69 = arith.constant 0 : index
      %119 = vector.load %arg5[%c0_67, %c0_68, %c0_69] : memref<1x64x128xf32, #tpu.memory_space<vmem>>, vector<1x64x128xf32>
      tpu.vector_store %arg5[%c0_67, %c0_68, %c0_69], %118 {strides = array<i32>} : memref<1x64x128xf32, #tpu.memory_space<vmem>>, vector<1x64x128xf32>,
    } else {
    }
    %cst = arith.constant 0.000000e+00 : f32
    %3 = vector.broadcast %cst : f32 to vector<8x128xf32>
    %cst_1 = arith.constant 0.000000e+00 : f32
    %4 = vector.broadcast %cst_1 : f32 to vector<8x128xf32>
    %cst_2 = arith.constant 0.000000e+00 : f32
    %5 = vector.broadcast %cst_2 : f32 to vector<8x128xf32>
    %cst_3 = arith.constant 0.000000e+00 : f32
    %6 = vector.broadcast %cst_3 : f32 to vector<8x128xf32>
    %cst_4 = arith.constant 0.000000e+00 : f32
    %7 = vector.broadcast %cst_4 : f32 to vector<8x128xf32>
    %cst_5 = arith.constant 0.000000e+00 : f32
    %8 = vector.broadcast %cst_5 : f32 to vector<8x128xf32>
    %cst_6 = arith.constant 0.000000e+00 : f32
    %9 = vector.broadcast %cst_6 : f32 to vector<8x128xf32>
    %cst_7 = arith.constant 0.000000e+00 : f32
    %10 = vector.broadcast %cst_7 : f32 to vector<8x128xf32>
    %c0_i32_8 = arith.constant 0 : i32
    %c16_i32 = arith.constant 16 : i32
    %11 = arith.muli %c0_i32_8, %c16_i32 : i32
    %12 = tpu.assume_multiple %11, 16 : i32
    %13 = arith.index_cast %12 : i32 to index
    %c0 = arith.constant 0 : index
    %14 = vector.load %arg3[%13, %c0] : memref<16x128xf32, #tpu.memory_space<vmem>>, vector<16x128xf32>
    %15 = arith.index_cast %12 : i32 to index
    %c0_9 = arith.constant 0 : index
    %16 = vector.load %arg2[%15, %c0_9] : memref<16x128xf32, #tpu.memory_space<vmem>>, vector<16x128xf32>
    %cst_10 = arith.constant 1.000000e+00 : f32
    %17 = vector.broadcast %cst_10 : f32 to vector<16x128xf32>
    %18 = arith.subf %17, %16 : vector<16x128xf32>
    %cst_11 = arith.constant 0.000000e+00 : f32
    %19 = vector.broadcast %cst_11 : f32 to vector<16x128xf32>
    %20 = arith.subf %19, %14 : vector<16x128xf32>
    %cst_12 = arith.constant 0.000000e+00 : f32
    %21 = vector.broadcast %cst_12 : f32 to vector<16x128xf32>
    %22 = arith.maximumf %20, %21 : vector<16x128xf32>
    %23 = math.absf %14 : vector<16x128xf32>
    %cst_13 = arith.constant 0.000000e+00 : f32
    %24 = vector.broadcast %cst_13 : f32 to vector<16x128xf32>
    %25 = arith.subf %24, %23 : vector<16x128xf32>
    %26 = math.exp %25 : vector<16x128xf32>
    %27 = math.log1p %26 : vector<16x128xf32>
    %28 = arith.addf %22, %27 : vector<16x128xf32>
    %29 = arith.addf %28, %14 : vector<16x128xf32>
    %30 = arith.mulf %16, %28 : vector<16x128xf32>
    %31 = arith.mulf %18, %29 : vector<16x128xf32>
    %c0_14 = arith.constant 0 : index
    %32 = arith.index_cast %12 : i32 to index
    %c0_15 = arith.constant 0 : index
    %33 = vector.load %arg4[%c0_14, %32, %c0_15] : memref<2x16x128xi8, #tpu.memory_space<vmem>>, vector<1x16x128xi8>
    %34 = vector.shape_cast %33 : vector<1x16x128xi8> to vector<16x128xi8>
    %35 = arith.sitofp %34 : vector<16x128xi8> to vector<16x128xf32>
    %36 = arith.mulf %35, %30 : vector<16x128xf32>
    %37 = vector.shape_cast %36 : vector<16x128xf32> to vector<2x8x128xf32>
    %cst_16 = arith.constant dense<0.000000e+00> : vector<8x128xf32>
    %38 = vector.multi_reduction <add>, %37, %cst_16 [0] : vector<2x8x128xf32> to vector<8x128xf32>
    %39 = arith.addf %3, %38 : vector<8x128xf32>
    %40 = arith.mulf %35, %31 : vector<16x128xf32>
    %41 = vector.shape_cast %40 : vector<16x128xf32> to vector<2x8x128xf32>
    %cst_17 = arith.constant dense<0.000000e+00> : vector<8x128xf32>
    %42 = vector.multi_reduction <add>, %41, %cst_17 [0] : vector<2x8x128xf32> to vector<8x128xf32>
    %43 = arith.addf %4, %42 : vector<8x128xf32>
    %44 = arith.mulf %35, %16 : vector<16x128xf32>
    %45 = vector.shape_cast %44 : vector<16x128xf32> to vector<2x8x128xf32>
    %cst_18 = arith.constant dense<0.000000e+00> : vector<8x128xf32>
    %46 = vector.multi_reduction <add>, %45, %cst_18 [0] : vector<2x8x128xf32> to vector<8x128xf32>
    %47 = arith.addf %5, %46 : vector<8x128xf32>
    %48 = vector.shape_cast %35 : vector<16x128xf32> to vector<2x8x128xf32>
    %cst_19 = arith.constant dense<0.000000e+00> : vector<8x128xf32>
    %49 = vector.multi_reduction <add>, %48, %cst_19 [0] : vector<2x8x128xf32> to vector<8x128xf32>
    %50 = arith.addf %6, %49 : vector<8x128xf32>
    %c1 = arith.constant 1 : index
    %51 = arith.index_cast %12 : i32 to index
    %c0_20 = arith.constant 0 : index
    %52 = vector.load %arg4[%c1, %51, %c0_20] : memref<2x16x128xi8, #tpu.memory_space<vmem>>, vector<1x16x128xi8>
    %53 = vector.shape_cast %52 : vector<1x16x128xi8> to vector<16x128xi8>
    %54 = arith.sitofp %53 : vector<16x128xi8> to vector<16x128xf32>
    %55 = arith.mulf %54, %30 : vector<16x128xf32>
    %56 = vector.shape_cast %55 : vector<16x128xf32> to vector<2x8x128xf32>
    %cst_21 = arith.constant dense<0.000000e+00> : vector<8x128xf32>
    %57 = vector.multi_reduction <add>, %56, %cst_21 [0] : vector<2x8x128xf32> to vector<8x128xf32>
    %58 = arith.addf %7, %57 : vector<8x128xf32>
    %59 = arith.mulf %54, %31 : vector<16x128xf32>
    %60 = vector.shape_cast %59 : vector<16x128xf32> to vector<2x8x128xf32>
    %cst_22 = arith.constant dense<0.000000e+00> : vector<8x128xf32>
    %61 = vector.multi_reduction <add>, %60, %cst_22 [0] : vector<2x8x128xf32> to vector<8x128xf32>
    %62 = arith.addf %8, %61 : vector<8x128xf32>
    %63 = arith.mulf %54, %16 : vector<16x128xf32>
    %64 = vector.shape_cast %63 : vector<16x128xf32> to vector<2x8x128xf32>
    %cst_23 = arith.constant dense<0.000000e+00> : vector<8x128xf32>
    %65 = vector.multi_reduction <add>, %64, %cst_23 [0] : vector<2x8x128xf32> to vector<8x128xf32>
    %66 = arith.addf %9, %65 : vector<8x128xf32>
    %67 = vector.shape_cast %54 : vector<16x128xf32> to vector<2x8x128xf32>
    %cst_24 = arith.constant dense<0.000000e+00> : vector<8x128xf32>
    %68 = vector.multi_reduction <add>, %67, %cst_24 [0] : vector<2x8x128xf32> to vector<8x128xf32>
    %69 = arith.addf %10, %68 : vector<8x128xf32>
    %c1_i32 = arith.constant 1 : i32
    %c0_25 = arith.constant 0 : index
    %c0_26 = arith.constant 0 : index
    %c0_27 = arith.constant 0 : index
    %70 = vector.load %arg5[%c0_25, %c0_26, %c0_27] : memref<1x64x128xf32, #tpu.memory_space<vmem>>, vector<1x8x128xf32>
    %71 = vector.shape_cast %70 : vector<1x8x128xf32> to vector<8x128xf32>
    %72 = arith.addf %71, %39 : vector<8x128xf32>
    %c0_28 = arith.constant 0 : index
    %c0_29 = arith.constant 0 : index
    %c0_30 = arith.constant 0 : index
    %73 = vector.load %arg5[%c0_28, %c0_29, %c0_30] : memref<1x64x128xf32, #tpu.memory_space<vmem>>, vector<1x8x128xf32>
    %74 = vector.shape_cast %73 : vector<1x8x128xf32> to vector<8x128xf32>
    %75 = vector.shape_cast %72 : vector<8x128xf32> to vector<1x8x128xf32>
    tpu.vector_store %arg5[%c0_28, %c0_29, %c0_30], %75 {strides = array<i32>} : memref<1x64x128xf32, #tpu.memory_space<vmem>>, vector<1x8x128xf32>,
    %c0_31 = arith.constant 0 : index
    %c8 = arith.constant 8 : index
    %c0_32 = arith.constant 0 : index
    %76 = vector.load %arg5[%c0_31, %c8, %c0_32] : memref<1x64x128xf32, #tpu.memory_space<vmem>>, vector<1x8x128xf32>
    %77 = vector.shape_cast %76 : vector<1x8x128xf32> to vector<8x128xf32>
    %78 = arith.addf %77, %43 : vector<8x128xf32>
    %c0_33 = arith.constant 0 : index
    %c8_34 = arith.constant 8 : index
    %c0_35 = arith.constant 0 : index
    %79 = vector.load %arg5[%c0_33, %c8_34, %c0_35] : memref<1x64x128xf32, #tpu.memory_space<vmem>>, vector<1x8x128xf32>
    %80 = vector.shape_cast %79 : vector<1x8x128xf32> to vector<8x128xf32>
    %81 = vector.shape_cast %78 : vector<8x128xf32> to vector<1x8x128xf32>
    tpu.vector_store %arg5[%c0_33, %c8_34, %c0_35], %81 {strides = array<i32>} : memref<1x64x128xf32, #tpu.memory_space<vmem>>, vector<1x8x128xf32>,
    %c0_36 = arith.constant 0 : index
    %c16 = arith.constant 16 : index
    %c0_37 = arith.constant 0 : index
    %82 = vector.load %arg5[%c0_36, %c16, %c0_37] : memref<1x64x128xf32, #tpu.memory_space<vmem>>, vector<1x8x128xf32>
    %83 = vector.shape_cast %82 : vector<1x8x128xf32> to vector<8x128xf32>
    %84 = arith.addf %83, %47 : vector<8x128xf32>
    %c0_38 = arith.constant 0 : index
    %c16_39 = arith.constant 16 : index
    %c0_40 = arith.constant 0 : index
    %85 = vector.load %arg5[%c0_38, %c16_39, %c0_40] : memref<1x64x128xf32, #tpu.memory_space<vmem>>, vector<1x8x128xf32>
    %86 = vector.shape_cast %85 : vector<1x8x128xf32> to vector<8x128xf32>
    %87 = vector.shape_cast %84 : vector<8x128xf32> to vector<1x8x128xf32>
    tpu.vector_store %arg5[%c0_38, %c16_39, %c0_40], %87 {strides = array<i32>} : memref<1x64x128xf32, #tpu.memory_space<vmem>>, vector<1x8x128xf32>,
    %c0_41 = arith.constant 0 : index
    %c24 = arith.constant 24 : index
    %c0_42 = arith.constant 0 : index
    %88 = vector.load %arg5[%c0_41, %c24, %c0_42] : memref<1x64x128xf32, #tpu.memory_space<vmem>>, vector<1x8x128xf32>
    %89 = vector.shape_cast %88 : vector<1x8x128xf32> to vector<8x128xf32>
    %90 = arith.addf %89, %50 : vector<8x128xf32>
    %c0_43 = arith.constant 0 : index
    %c24_44 = arith.constant 24 : index
    %c0_45 = arith.constant 0 : index
    %91 = vector.load %arg5[%c0_43, %c24_44, %c0_45] : memref<1x64x128xf32, #tpu.memory_space<vmem>>, vector<1x8x128xf32>
    %92 = vector.shape_cast %91 : vector<1x8x128xf32> to vector<8x128xf32>
    %93 = vector.shape_cast %90 : vector<8x128xf32> to vector<1x8x128xf32>
    tpu.vector_store %arg5[%c0_43, %c24_44, %c0_45], %93 {strides = array<i32>} : memref<1x64x128xf32, #tpu.memory_space<vmem>>, vector<1x8x128xf32>,
    %c0_46 = arith.constant 0 : index
    %c32 = arith.constant 32 : index
    %c0_47 = arith.constant 0 : index
    %94 = vector.load %arg5[%c0_46, %c32, %c0_47] : memref<1x64x128xf32, #tpu.memory_space<vmem>>, vector<1x8x128xf32>
    %95 = vector.shape_cast %94 : vector<1x8x128xf32> to vector<8x128xf32>
    %96 = arith.addf %95, %58 : vector<8x128xf32>
    %c0_48 = arith.constant 0 : index
    %c32_49 = arith.constant 32 : index
    %c0_50 = arith.constant 0 : index
    %97 = vector.load %arg5[%c0_48, %c32_49, %c0_50] : memref<1x64x128xf32, #tpu.memory_space<vmem>>, vector<1x8x128xf32>
    %98 = vector.shape_cast %97 : vector<1x8x128xf32> to vector<8x128xf32>
    %99 = vector.shape_cast %96 : vector<8x128xf32> to vector<1x8x128xf32>
    tpu.vector_store %arg5[%c0_48, %c32_49, %c0_50], %99 {strides = array<i32>} : memref<1x64x128xf32, #tpu.memory_space<vmem>>, vector<1x8x128xf32>,
    %c0_51 = arith.constant 0 : index
    %c40 = arith.constant 40 : index
    %c0_52 = arith.constant 0 : index
    %100 = vector.load %arg5[%c0_51, %c40, %c0_52] : memref<1x64x128xf32, #tpu.memory_space<vmem>>, vector<1x8x128xf32>
    %101 = vector.shape_cast %100 : vector<1x8x128xf32> to vector<8x128xf32>
    %102 = arith.addf %101, %62 : vector<8x128xf32>
    %c0_53 = arith.constant 0 : index
    %c40_54 = arith.constant 40 : index
    %c0_55 = arith.constant 0 : index
    %103 = vector.load %arg5[%c0_53, %c40_54, %c0_55] : memref<1x64x128xf32, #tpu.memory_space<vmem>>, vector<1x8x128xf32>
    %104 = vector.shape_cast %103 : vector<1x8x128xf32> to vector<8x128xf32>
    %105 = vector.shape_cast %102 : vector<8x128xf32> to vector<1x8x128xf32>
    tpu.vector_store %arg5[%c0_53, %c40_54, %c0_55], %105 {strides = array<i32>} : memref<1x64x128xf32, #tpu.memory_space<vmem>>, vector<1x8x128xf32>,
    %c0_56 = arith.constant 0 : index
    %c48 = arith.constant 48 : index
    %c0_57 = arith.constant 0 : index
    %106 = vector.load %arg5[%c0_56, %c48, %c0_57] : memref<1x64x128xf32, #tpu.memory_space<vmem>>, vector<1x8x128xf32>
    %107 = vector.shape_cast %106 : vector<1x8x128xf32> to vector<8x128xf32>
    %108 = arith.addf %107, %66 : vector<8x128xf32>
    %c0_58 = arith.constant 0 : index
    %c48_59 = arith.constant 48 : index
    %c0_60 = arith.constant 0 : index
    %109 = vector.load %arg5[%c0_58, %c48_59, %c0_60] : memref<1x64x128xf32, #tpu.memory_space<vmem>>, vector<1x8x128xf32>
    %110 = vector.shape_cast %109 : vector<1x8x128xf32> to vector<8x128xf32>
    %111 = vector.shape_cast %108 : vector<8x128xf32> to vector<1x8x128xf32>
    tpu.vector_store %arg5[%c0_58, %c48_59, %c0_60], %111 {strides = array<i32>} : memref<1x64x128xf32, #tpu.memory_space<vmem>>, vector<1x8x128xf32>,
    %c0_61 = arith.constant 0 : index
    %c56 = arith.constant 56 : index
    %c0_62 = arith.constant 0 : index
    %112 = vector.load %arg5[%c0_61, %c56, %c0_62] : memref<1x64x128xf32, #tpu.memory_space<vmem>>, vector<1x8x128xf32>
    %113 = vector.shape_cast %112 : vector<1x8x128xf32> to vector<8x128xf32>
    %114 = arith.addf %113, %69 : vector<8x128xf32>
    %c0_63 = arith.constant 0 : index
    %c56_64 = arith.constant 56 : index
    %c0_65 = arith.constant 0 : index
    %115 = vector.load %arg5[%c0_63, %c56_64, %c0_65] : memref<1x64x128xf32, #tpu.memory_space<vmem>>, vector<1x8x128xf32>
    %116 = vector.shape_cast %115 : vector<1x8x128xf32> to vector<8x128xf32>
    %117 = vector.shape_cast %114 : vector<8x128xf32> to vector<1x8x128xf32>
    tpu.vector_store %arg5[%c0_63, %c56_64, %c0_65], %117 {strides = array<i32>} : memref<1x64x128xf32, #tpu.memory_space<vmem>>, vector<1x8x128xf32>,
    return
  }
  func.func @transform_0(%arg0: i32, %arg1: i32) -> (i32, i32) {
    %c1_i32 = arith.constant 1 : i32
    %0 = arith.muli %arg0, %c1_i32 : i32
    %1 = arith.addi %0, %arg1 : i32
    %c0_i32 = arith.constant 0 : i32
    %2 = arith.minsi %1, %c0_i32 : i32
    %c0_i32_0 = arith.constant 0 : i32
    %c0_i32_1 = arith.constant 0 : i32
    return %2, %c0_i32_0 : i32, i32
  }
  func.func @transform_1(%arg0: i32, %arg1: i32) -> (i32, i32) {
    %c1_i32 = arith.constant 1 : i32
    %0 = arith.muli %arg0, %c1_i32 : i32
    %1 = arith.addi %0, %arg1 : i32
    %c0_i32 = arith.constant 0 : i32
    %2 = arith.minsi %1, %c0_i32 : i32
    %c0_i32_0 = arith.constant 0 : i32
    %c0_i32_1 = arith.constant 0 : i32
    return %2, %c0_i32_0 : i32, i32
  }
  func.func @transform_2(%arg0: i32, %arg1: i32) -> (i32, i32, i32) {
    %c1_i32 = arith.constant 1 : i32
    %0 = arith.muli %arg0, %c1_i32 : i32
    %1 = arith.addi %0, %arg1 : i32
    %c0_i32 = arith.constant 0 : i32
    %2 = arith.minsi %1, %c0_i32 : i32
    %c0_i32_0 = arith.constant 0 : i32
    %c0_i32_1 = arith.constant 0 : i32
    %c0_i32_2 = arith.constant 0 : i32
    return %c0_i32_0, %2, %c0_i32_1 : i32, i32, i32
  }
  func.func @transform_3(%arg0: i32, %arg1: i32) -> (i32, i32, i32) {
    %c0_i32 = arith.constant 0 : i32
    %c0_i32_0 = arith.constant 0 : i32
    %c0_i32_1 = arith.constant 0 : i32
    return %arg0, %c0_i32, %c0_i32_0 : i32, i32, i32
  }
}

</mosaic_0001>

<bundles_post_ra>
// kernel: tpu_custom_call.1
= control target key start
LH: loop header
LB: loop body
LE: loop exit
PB: predicated region body
PF: predicated region fallthrough
CT: control target
= control target key end

     0   :  { %8 = vsyncpa [#allocation3], 0  ;;  %s440_s0 = inlined_call_operand.hbm [shape: f32[16,128], index: 0, kind: input, shape index: {}]   ;;  %s441_s1 = inlined_call_operand.hbm [shape: f32[16,128], index: 1, kind: input, shape index: {}]   ;;  %s442_s2 = inlined_call_operand.hbm [shape: s8[2,16,128], index: 2, kind: input, shape index: {}]   ;;  %s443_s3 = inlined_call_operand.hbm [shape: f32[1,64,128], index: 3, kind: output, shape index: {}]  }
   0x1   :  { %9 = vsyncpa [#allocation6], 0 }
   0x2   :  { %10 = vsyncpa [#allocation4], 0  ;;  %s40_s14 = sshll.u32 %s441_s1, 4  ;;  %s369_s15 = smov [#allocation5]   ;;  %s41_s14 = int_to_ptr.hbm [resolvable:$true] %s40_s14 }
   0x3   :  { %s42_s16 = sshll.u32 %s369_s15, 4  ;;  %s21_s19 = sshll.u32 %s440_s0, 4  ;;  %s43_s16 = int_to_ptr.vmem [resolvable:$true] %s42_s16  ;;  %s22_s19 = int_to_ptr.hbm [resolvable:$true] %s21_s19 }
   0x4   :  { %s370_s20 = smov 128   ;;  %s371_s21 = smov 8  }
   0x5   :  { %48 = dma.hbm_to_vmem [thread:$0]  %s41_s14, 256, %s43_s16, [#allocation6], %s370_s20, %s370_s20, %s371_s21  }
   0x6   :  { %s372_s22 = smov [#allocation2]   ;;  %s59_s1 = sshll.u32 %s442_s2, 4  ;;  %s60_s1 = int_to_ptr.hbm [resolvable:$true] %s59_s1 }
   0x7   :  { %s23_s23 = sshll.u32 %s372_s22, 4  ;;  %s373_s0 = smov [#allocation7]   ;;  %s24_s23 = int_to_ptr.vmem [resolvable:$true] %s23_s23 }
   0x8   :  { %29 = dma.hbm_to_vmem [thread:$0]  %s22_s19, 256, %s24_s23, [#allocation3], %s370_s20, %s370_s20, %s371_s21  }
   0x9   :  { %s61_s26 = sshll.u32 %s373_s0, 4  ;;  %s374_s27 = smov 32   ;;  %s62_s26 = int_to_ptr.vmem [resolvable:$true] %s61_s26 }
   0xa   :  { %s375_s28 = smov 2  }
   0xb   :  { %67 = dma.hbm_to_vmem [thread:$0]  %s60_s1, 128, %s62_s26, [#allocation6], %s374_s27, %s374_s27, %s375_s28  }
   0xc   :  { %363 = dma.done.wait [#allocation3], 256  }
   0xd   :  { %364 = vsyncadd [#allocation3], 4294967040 }
   0xe   :  { %365 = dma.done.wait [#allocation6], 384  }
   0xf   :  { %366 = vsyncadd [#allocation6], 4294966912  ;;  %v412_v0 = vld [vmem:[#allocation5] sm:$0xff]  ;;  %v414_v1 = vld [vmem:[#allocation5 + $0x8] sm:$0xff]  ;;  %s376_s2 = smov [#allocation8]   ;;  %s221_s5 = sshll.u32 %s443_s3, 4  ;;  %s222_s5 = int_to_ptr.hbm [resolvable:$true] %s221_s5 }
  0x10   :  { %v114_v2 = vand.u32 2147483647, %v412_v0  ;;  %v243_v3 = vld [vmem:[#allocation7] sm:$0xff]   ;;  %v115_v4 = vand.u32 2147483647, %v414_v1  ;;  %v107_v13 = vld [vmem:[#allocation2 + $0x8] sm:$0xff] }
  0x11   :  { %v244_v5 = vunpack.c.0.s8 %v243_v3  ;;  %v245_v6 = vunpack.c.1.s8 %v243_v3  ;;  %v248_v11 = vunpack.c.2.s8 %v243_v3  ;;  %v106_v12 = vld [vmem:[#allocation2] sm:$0xff]  ;;  %v249_v15 = vunpack.c.3.s8 %v243_v3  ;;  %s219_s29 = sshll.u32 %s376_s2, 4  ;;  %s220_s29 = int_to_ptr.vmem [resolvable:$true] %s219_s29 }
  0x12   :  { %v116_v7 = vsub.f32 0.0, %v114_v2  ;;  %v117_v8 = vsub.f32 0.0, %v115_v4  ;;  %v110_v34 = vsub.f32 0.0, %v412_v0  ;;  %v111_v37 = vsub.f32 0.0, %v414_v1 }
  0x13   :  { %v418_v9 = vcvt.s32.f32 %v244_v5  ;;  %v420_v10 = vcvt.s32.f32 %v245_v6  ;;  %v175_v20 = vcvt.s32.f32 %v248_v11  ;;  %v176_v21 = vcvt.s32.f32 %v249_v15 }
  0x14   :  { %v118_v14 = vmul.f32 1.442695, %v116_v7  ;;  %v120_v16 = vmul.f32 1.442695, %v117_v8  ;;  %v112_v41 = vmax.f32 %v110_v34, 0.0  ;;  %v113_v44 = vmax.f32 %v111_v37, 0.0 }
  0x15   :  { %v162_v17 = vmul.f32 %v418_v9, %v106_v12  ;;  %v163_v18 = vmul.f32 %v420_v10, %v107_v13  ;;  %v166_v19 = vadd.f32 %v420_v10, %v418_v9  ;;  %v185_v23 = vmul.f32 %v175_v20, %v106_v12 }
  0x16   :  { %259 = vpow2.f32 %v118_v14  ;;  %v186_v24 = vmul.f32 %v176_v21, %v107_v13  ;;  %v189_v25 = vadd.f32 %v176_v21, %v175_v20  ;;  %v108_v50 = vsub.f32 1.0, %v106_v12 }
  0x17   :  { %261 = vpow2.f32 %v120_v16  ;;  %v164_v22 = vadd.f32 %v163_v18, %v162_v17  ;;  %202 = vst [vmem:[#allocation8 + $0x18] sm:$0xff] %v166_v19  ;;  %v109_v52 = vsub.f32 1.0, %v107_v13 }
  0x18   :  { %v187_v26 = vadd.f32 %v186_v24, %v185_v23  ;;  %214 = vst [vmem:[#allocation8 + $0x38] sm:$0xff] %v189_v25 }
  0x19   :  { %199 = vst [vmem:[#allocation8 + $0x10] sm:$0xff] %v164_v22 }
  0x1a   :  { %211 = vst [vmem:[#allocation8 + $0x30] sm:$0xff] %v187_v26 }
  0x1c   :  { %v260_v27 = vpop.eup %259 }
  0x1d   :  { %v262_v28 = vpop.eup %261  ;;  %v122_v29 = vadd.f32 1.0, %v260_v27  ;;  %v125_v30 = vmul.f32 -0.5, %v260_v27  ;;  %v128_v35 = vand.u32 2147483647, %v260_v27 }
  0x1e   :  { %v131_v31 = vadd.f32 1.0, %v262_v28  ;;  %v134_v32 = vmul.f32 -0.5, %v262_v28  ;;  %v137_v38 = vand.u32 2147483647, %v262_v28 }
  0x1f   :  { %263 = vlog2.f32 %v122_v29  ;;  %v126_v33 = vadd.f32 1.0, %v125_v30  ;;  %vm129_vm0 = vcmp.lt.f32.partialorder %v128_v35, 0.0004427343 }
  0x20   :  { %265 = vlog2.f32 %v131_v31  ;;  %v135_v36 = vadd.f32 1.0, %v134_v32  ;;  %vm138_vm1 = vcmp.lt.f32.partialorder %v137_v38, 0.0004427343 }
  0x21   :  { %v127_v39 = vmul.f32 %v260_v27, %v126_v33 }
  0x22   :  { %v136_v42 = vmul.f32 %v262_v28, %v135_v36 }
  0x25   :  { %v264_v40 = vpop.eup %263 }
  0x26   :  { %v266_v43 = vpop.eup %265  ;;  %v124_v45 = vmul.f32 0.6931472, %v264_v40 }
  0x27   :  { %v133_v46 = vmul.f32 0.6931472, %v266_v43 }
  0x28   :  { %v130_v47 = vsel %vm129_vm0, %v127_v39, %v124_v45 }
  0x29   :  { %v139_v48 = vsel %vm138_vm1, %v136_v42, %v133_v46  ;;  %v140_v49 = vadd.f32 %v130_v47, %v112_v41 }
  0x2a   :  { %v141_v51 = vadd.f32 %v139_v48, %v113_v44 }
  0x2b   :  { %v144_v53 = vmul.f32 %v140_v49, %v106_v12  ;;  %v142_v54 = vadd.f32 %v140_v49, %v412_v0 }
  0x2c   :  { %v145_v55 = vmul.f32 %v141_v51, %v107_v13  ;;  %v143_v56 = vadd.f32 %v141_v51, %v414_v1 }
  0x2d   :  { %v154_v57 = vmul.f32 %v418_v9, %v144_v53  ;;  %v146_v58 = vmul.f32 %v142_v54, %v108_v50  ;;  %v177_v59 = vmul.f32 %v175_v20, %v144_v53 }
  0x2e   :  { %v155_v60 = vmul.f32 %v420_v10, %v145_v55  ;;  %v147_v61 = vmul.f32 %v143_v56, %v109_v52  ;;  %v178_v62 = vmul.f32 %v176_v21, %v145_v55 }
  0x2f   :  { %v158_v63 = vmul.f32 %v418_v9, %v146_v58  ;;  %v181_v2 = vmul.f32 %v175_v20, %v146_v58 }
  0x30   :  { %v156_v3 = vadd.f32 %v155_v60, %v154_v57  ;;  %v159_v4 = vmul.f32 %v420_v10, %v147_v61  ;;  %v179_v5 = vadd.f32 %v178_v62, %v177_v59  ;;  %v182_v6 = vmul.f32 %v176_v21, %v147_v61 }
  0x32   :  { %v160_v0 = vadd.f32 %v159_v4, %v158_v63  ;;  %v183_v7 = vadd.f32 %v182_v6, %v181_v2  ;;  %193 = vst [vmem:[#allocation8] sm:$0xff] %v156_v3 }
  0x33   :  { %205 = vst [vmem:[#allocation8 + $0x20] sm:$0xff] %v179_v5 }
  0x34   :  { %196 = vst [vmem:[#allocation8 + $0x8] sm:$0xff] %v160_v0 }
  0x35   :  { %208 = vst [vmem:[#allocation8 + $0x28] sm:$0xff] %v183_v7 }
  0x36   :  { %227 = dma.vmem_to_hbm [thread:$0]  %s220_s29, 1024, %s222_s5, [#allocation4], %s370_s20, %s370_s20, %s371_s21  }
  0x37   :  { %367 = dma.done.wait [#allocation4], 1024  }
  0x38   :  { %368 = vsyncadd [#allocation4], 4294966272 }
  0x39   :  { %232 = vsyncpa [#allocation3], 1 }
  0x3a   :  { %233 = vsyncpa [#allocation6], 1 }
  0x3b   :  { %234 = vsyncpa [#allocation4], 1 }

</bundles_post_ra>
